<compile_context>
chip_gen: v7x
topology: tpu7x:2x2x1
jax: 0.10.0
libtpu: 0.0.40
codegen_flags: <defaults>
</compile_context>

<pallas_src>
import functools

import jax
import jax.numpy as jnp
from jax import lax
from jax.experimental import pallas as pl
from jax.experimental.pallas import tpu as pltpu


def _round_up(a, b):
    return (a + b - 1) // b * b


# ---------------------------------------------------------------------------
# Kernel: one L_tile of the flat (batch-folded) output axis
#   x_ref   : (C_in_pad, L_tile)   current flat tile of the padded input (bf16)
#   halo_ref: (C_in_pad, D_pad)    first D_pad lanes of the NEXT tile (halo, bf16)
#   w_ref   : (C_out, K_pad)       tap-folded weight, K_pad = kH*kW*C_in_pad (bf16)
#   b_ref   : (C_out, 1)           bias (f32)
#   o_ref   : (C_out, L_tile)      flat output tile (f32)
#   slab_ref: (K_pad, L_tile)      VMEM scratch holding the im2col slab (bf16)
# ---------------------------------------------------------------------------
def _deconv2d_kernel(x_ref, halo_ref, w_ref, b_ref, o_ref, slab_ref, *,
                     kH, kW, Wp, C_in_pad, L_tile):
    # Build the (K_pad, L_tile) slab: one sublane-aligned copy per kernel tap.  Every row
    # group is fully rewritten each grid step, so no init is needed (megacore-safe).
    for kh in range(kH):
        for kw in range(kW):
            r0 = (kh * kW + kw) * C_in_pad
            off = kh * Wp + kw                       # static flat shift of this tap
            if off == 0:
                slab_ref[r0:r0 + C_in_pad, :] = x_ref[...]
            else:
                slab_ref[r0:r0 + C_in_pad, 0:L_tile - off] = x_ref[:, off:L_tile]
                slab_ref[r0:r0 + C_in_pad, L_tile - off:L_tile] = halo_ref[:, 0:off]
    # One fat MXU matmul (K = kH*kW*C_in_pad) with f32 accumulation, bias add, dense store.
    acc = jnp.dot(w_ref[...], slab_ref[...], preferred_element_type=jnp.float32)
    o_ref[...] = (acc + b_ref[...]).astype(o_ref.dtype)


# ---------------------------------------------------------------------------
# Wrapper
# ---------------------------------------------------------------------------
def last_deconv2d(x, weight, bias, *, stride=(1, 1), padding=(1, 0),
                  l_tile=512, compute_dtype=jnp.bfloat16):
    """Forward of nn.ConvTranspose2d(C_in, C_out, (kH,kW), stride=(1,1), padding)."""
    assert tuple(stride) == (1, 1), "only stride=(1,1) (the module default) is supported"
    # TODO(synk): stride > 1 would need input dilation (interleaved zeros) before this kernel.
    B, C_in, H, W = x.shape
    C_in_w, C_out, kH, kW = weight.shape
    assert C_in_w == C_in
    ph_t, pw_t = padding
    ph, pw = kH - 1 - ph_t, kW - 1 - pw_t            # equivalent forward-conv padding
    assert ph >= 0 and pw >= 0, "padding must be <= kernel_size - 1"
    Hp, Wp = H + 2 * ph, W + 2 * pw
    H_out, W_out = Hp - (kH - 1), Wp - (kW - 1)

    # ---- tiling parameters -------------------------------------------------
    C_in_pad = _round_up(C_in, 8)                    # sublane-aligned channel groups
    D = (kH - 1) * Wp + (kW - 1)                     # max flat tap shift (halo depth)
    D_pad = max(128, _round_up(D, 128))              # lane-aligned halo block width
    L_tile = _round_up(max(l_tile, D + 1), D_pad)    # 128-aligned, multiple of D_pad, > D
    ratio = L_tile // D_pad
    K_pad = kH * kW * C_in_pad

    N = B * Hp * Wp                                  # batch folded into the flat lane axis
    num_tiles = pl.cdiv(N, L_tile)
    N_out = num_tiles * L_tile                       # lane-dense kernel output span
    N_flat = N_out + L_tile                          # + one zero tile => halo always in range

    # ---- wrapper-side layout plumbing (plain XLA) --------------------------
    x_pad = jnp.pad(x, ((0, 0), (0, C_in_pad - C_in), (ph, ph), (pw, pw)))
    x_cf = jnp.transpose(x_pad, (1, 0, 2, 3)).reshape(C_in_pad, N)
    x_cf = jnp.pad(x_cf, ((0, 0), (0, N_flat - N))).astype(compute_dtype)

    w_flip = weight[:, :, ::-1, ::-1]                          # (C_in, C_out, kH, kW)
    w_t = jnp.transpose(w_flip, (2, 3, 0, 1))                  # (kH, kW, C_in, C_out)
    w_t = jnp.pad(w_t, ((0, 0), (0, 0), (0, C_in_pad - C_in), (0, 0)))
    w_big = jnp.transpose(w_t.reshape(K_pad, C_out), (1, 0)).astype(compute_dtype)
    b_col = bias.reshape(C_out, 1).astype(jnp.float32)

    # ---- VMEM budget (double-buffered tiles + resident weights + slab) -----
    bpe = 2 if compute_dtype == jnp.bfloat16 else 4
    est = (2 * C_in_pad * L_tile * bpe              # input tile (double buffered)
           + 2 * C_in_pad * D_pad * bpe             # halo tile  (double buffered)
           + C_out * max(K_pad, 128) * bpe          # resident weight
           + C_out * 128 * 4                        # resident bias
           + 2 * C_out * L_tile * 4                 # output tile (f32, double buffered)
           + K_pad * L_tile * bpe)                  # slab scratch
    # Keep the request modest so it is safe on v7x (64 MiB physical); on v5e/v6e this could
    # be raised toward ~96 MiB together with a larger l_tile.
    vmem_limit = int(min(40 * 2**20, max(16 * 2**20, 2 * est)))

    kernel = functools.partial(_deconv2d_kernel, kH=kH, kW=kW, Wp=Wp,
                               C_in_pad=C_in_pad, L_tile=L_tile)
    out_flat = pl.pallas_call(
        kernel,
        out_shape=jax.ShapeDtypeStruct((C_out, N_out), jnp.float32),
        grid=(num_tiles,),
        in_specs=[
            pl.BlockSpec((C_in_pad, L_tile), lambda j: (0, j)),               # current tile
            pl.BlockSpec((C_in_pad, D_pad), lambda j: (0, (j + 1) * ratio)),  # halo of next
            pl.BlockSpec((C_out, K_pad), lambda j: (0, 0)),                   # weights
            pl.BlockSpec((C_out, 1), lambda j: (0, 0)),                       # bias
        ],
        out_specs=pl.BlockSpec((C_out, L_tile), lambda j: (0, j)),
        scratch_shapes=[pltpu.VMEM((K_pad, L_tile), compute_dtype)],
        compiler_params=pltpu.CompilerParams(
            dimension_semantics=("parallel",),
            vmem_limit_bytes=vmem_limit),
    )(x_cf, x_cf, w_big, b_col)

    # Unpack: flat axis is (B, Hp, Wp); keep only valid output rows/cols, go back to NCHW.
    out = out_flat[:, :N].reshape(C_out, B, Hp, Wp)[:, :, :H_out, :W_out]
    return jnp.transpose(out, (1, 0, 2, 3)).astype(x.dtype)


# ---------------------------------------------------------------------------
# Pure-JAX reference (mirrors PyTorch ConvTranspose2d, stride=1) for verification
# ---------------------------------------------------------------------------
def ref_deconv2d(x, weight, bias, *, stride=(1, 1), padding=(1, 0)):
    assert tuple(stride) == (1, 1)
    C_in, C_out, kH, kW = weight.shape
    w = jnp.transpose(weight[:, :, ::-1, ::-1], (1, 0, 2, 3))          # (C_out, C_in, kH, kW)
    ph, pw = kH - 1 - padding[0], kW - 1 - padding[1]
    y = lax.conv_general_dilated(
        x, w, window_strides=(1, 1), padding=[(ph, ph), (pw, pw)],
        dimension_numbers=("NCHW", "OIHW", "NCHW"),
        precision=lax.Precision.HIGHEST)
    return y + bias[None, :, None, None]


# ---------------------------------------------------------------------------
if __name__ == "__main__":
    B, C_in, C_out, H, W = 2, 4, 8, 16, 16
    kH, kW = 3, 3
    padding = (1, 0)

    key = jax.random.PRNGKey(0)
    kx, kwt, kb = jax.random.split(key, 3)
    x = jax.random.normal(kx, (B, C_in, H, W), jnp.float32)
    weight = 0.1 * jax.random.normal(kwt, (C_in, C_out, kH, kW), jnp.float32)  # torch layout
    bias = 0.1 * jax.random.normal(kb, (C_out,), jnp.float32)

    out = last_deconv2d(x, weight, bias, padding=padding)
    out = jax.block_until_ready(out)

    ref = ref_deconv2d(x, weight, bias, padding=padding)
    assert out.shape == ref.shape == (B, C_out, H, W + 2), out.shape

    # Tight check: reference with identically bf16-quantized operands (isolates kernel math).
    ref_q = ref_deconv2d(x.astype(jnp.bfloat16).astype(jnp.float32),
                         weight.astype(jnp.bfloat16).astype(jnp.float32), bias,
                         padding=padding)
    assert jnp.allclose(out, ref_q, atol=1e-3, rtol=1e-3), \
        float(jnp.max(jnp.abs(out - ref_q)))
    # Loose sanity check against the full-f32 reference (bf16 input quantization noise).
    assert jnp.allclose(out, ref, atol=1e-1, rtol=1e-1), \
        float(jnp.max(jnp.abs(out - ref)))

    print("KERNEL_OK")
</pallas_src>

<mosaic_0001>
module attributes {stable_mosaic.version = 11 : i64} {
  func.func @_deconv2d_kernel(%arg0: i32, %arg1: memref<8x512xbf16, #tpu.memory_space<vmem>>, %arg2: memref<8x128xbf16, #tpu.memory_space<vmem>>, %arg3: memref<8x72xbf16, #tpu.memory_space<vmem>>, %arg4: memref<8x1xf32, #tpu.memory_space<vmem>>, %arg5: memref<8x512xf32, #tpu.memory_space<vmem>>, %arg6: memref<72x512xbf16, #tpu.memory_space<vmem>>) attributes {dimension_semantics = [#tpu.dimension_semantics<parallel>], iteration_bounds = array<i64: 2>, scalar_prefetch = 0 : i64, scratch_operands = 1 : i64, tpu.core_type = #tpu.core_type<tc>, window_params = [{transform_indices = @transform_0, window_bounds = array<i64: 8, 512>}, {transform_indices = @transform_1, window_bounds = array<i64: 8, 128>}, {pipeline_mode = #tpu.pipeline_mode<synchronous>, transform_indices = @transform_2, window_bounds = array<i64: 8, 72>}, {pipeline_mode = #tpu.pipeline_mode<synchronous>, transform_indices = @transform_3, window_bounds = array<i64: 8, 1>}, {transform_indices = @transform_4, window_bounds = array<i64: 8, 512>}]} {
    %c0 = arith.constant 0 : index
    %c0_0 = arith.constant 0 : index
    %0 = vector.load %arg1[%c0, %c0_0] : memref<8x512xbf16, #tpu.memory_space<vmem>>, vector<8x512xbf16>
    %c0_1 = arith.constant 0 : index
    %c0_2 = arith.constant 0 : index
    %1 = vector.load %arg6[%c0_1, %c0_2] : memref<72x512xbf16, #tpu.memory_space<vmem>>, vector<8x512xbf16>
    tpu.vector_store %arg6[%c0_1, %c0_2], %0 {strides = array<i32>} : memref<72x512xbf16, #tpu.memory_space<vmem>>, vector<8x512xbf16>,
    %c0_3 = arith.constant 0 : index
    %c1 = arith.constant 1 : index
    %2 = vector.load %arg1[%c0_3, %c1] : memref<8x512xbf16, #tpu.memory_space<vmem>>, vector<8x511xbf16>
    %c8 = arith.constant 8 : index
    %c0_4 = arith.constant 0 : index
    %3 = vector.load %arg6[%c8, %c0_4] : memref<72x512xbf16, #tpu.memory_space<vmem>>, vector<8x511xbf16>
    tpu.vector_store %arg6[%c8, %c0_4], %2 {strides = array<i32>} : memref<72x512xbf16, #tpu.memory_space<vmem>>, vector<8x511xbf16>,
    %c0_5 = arith.constant 0 : index
    %c0_6 = arith.constant 0 : index
    %4 = vector.load %arg2[%c0_5, %c0_6] : memref<8x128xbf16, #tpu.memory_space<vmem>>, vector<8x1xbf16>
    %c8_7 = arith.constant 8 : index
    %c511 = arith.constant 511 : index
    %5 = vector.load %arg6[%c8_7, %c511] : memref<72x512xbf16, #tpu.memory_space<vmem>>, vector<8x1xbf16>
    tpu.vector_store %arg6[%c8_7, %c511], %4 {strides = array<i32>} : memref<72x512xbf16, #tpu.memory_space<vmem>>, vector<8x1xbf16>,
    %c0_8 = arith.constant 0 : index
    %c2 = arith.constant 2 : index
    %6 = vector.load %arg1[%c0_8, %c2] : memref<8x512xbf16, #tpu.memory_space<vmem>>, vector<8x510xbf16>
    %c16 = arith.constant 16 : index
    %c0_9 = arith.constant 0 : index
    %7 = vector.load %arg6[%c16, %c0_9] : memref<72x512xbf16, #tpu.memory_space<vmem>>, vector<8x510xbf16>
    tpu.vector_store %arg6[%c16, %c0_9], %6 {strides = array<i32>} : memref<72x512xbf16, #tpu.memory_space<vmem>>, vector<8x510xbf16>,
    %c0_10 = arith.constant 0 : index
    %c0_11 = arith.constant 0 : index
    %8 = vector.load %arg2[%c0_10, %c0_11] : memref<8x128xbf16, #tpu.memory_space<vmem>>, vector<8x2xbf16>
    %c16_12 = arith.constant 16 : index
    %c510 = arith.constant 510 : index
    %9 = vector.load %arg6[%c16_12, %c510] : memref<72x512xbf16, #tpu.memory_space<vmem>>, vector<8x2xbf16>
    tpu.vector_store %arg6[%c16_12, %c510], %8 {strides = array<i32>} : memref<72x512xbf16, #tpu.memory_space<vmem>>, vector<8x2xbf16>,
    %c0_13 = arith.constant 0 : index
    %c20 = arith.constant 20 : index
    %10 = vector.load %arg1[%c0_13, %c20] : memref<8x512xbf16, #tpu.memory_space<vmem>>, vector<8x492xbf16>
    %c24 = arith.constant 24 : index
    %c0_14 = arith.constant 0 : index
    %11 = vector.load %arg6[%c24, %c0_14] : memref<72x512xbf16, #tpu.memory_space<vmem>>, vector<8x492xbf16>
    tpu.vector_store %arg6[%c24, %c0_14], %10 {strides = array<i32>} : memref<72x512xbf16, #tpu.memory_space<vmem>>, vector<8x492xbf16>,
    %c0_15 = arith.constant 0 : index
    %c0_16 = arith.constant 0 : index
    %12 = vector.load %arg2[%c0_15, %c0_16] : memref<8x128xbf16, #tpu.memory_space<vmem>>, vector<8x20xbf16>
    %c24_17 = arith.constant 24 : index
    %c492 = arith.constant 492 : index
    %13 = vector.load %arg6[%c24_17, %c492] : memref<72x512xbf16, #tpu.memory_space<vmem>>, vector<8x20xbf16>
    tpu.vector_store %arg6[%c24_17, %c492], %12 {strides = array<i32>} : memref<72x512xbf16, #tpu.memory_space<vmem>>, vector<8x20xbf16>,
    %c0_18 = arith.constant 0 : index
    %c21 = arith.constant 21 : index
    %14 = vector.load %arg1[%c0_18, %c21] : memref<8x512xbf16, #tpu.memory_space<vmem>>, vector<8x491xbf16>
    %c32 = arith.constant 32 : index
    %c0_19 = arith.constant 0 : index
    %15 = vector.load %arg6[%c32, %c0_19] : memref<72x512xbf16, #tpu.memory_space<vmem>>, vector<8x491xbf16>
    tpu.vector_store %arg6[%c32, %c0_19], %14 {strides = array<i32>} : memref<72x512xbf16, #tpu.memory_space<vmem>>, vector<8x491xbf16>,
    %c0_20 = arith.constant 0 : index
    %c0_21 = arith.constant 0 : index
    %16 = vector.load %arg2[%c0_20, %c0_21] : memref<8x128xbf16, #tpu.memory_space<vmem>>, vector<8x21xbf16>
    %c32_22 = arith.constant 32 : index
    %c491 = arith.constant 491 : index
    %17 = vector.load %arg6[%c32_22, %c491] : memref<72x512xbf16, #tpu.memory_space<vmem>>, vector<8x21xbf16>
    tpu.vector_store %arg6[%c32_22, %c491], %16 {strides = array<i32>} : memref<72x512xbf16, #tpu.memory_space<vmem>>, vector<8x21xbf16>,
    %c0_23 = arith.constant 0 : index
    %c22 = arith.constant 22 : index
    %18 = vector.load %arg1[%c0_23, %c22] : memref<8x512xbf16, #tpu.memory_space<vmem>>, vector<8x490xbf16>
    %c40 = arith.constant 40 : index
    %c0_24 = arith.constant 0 : index
    %19 = vector.load %arg6[%c40, %c0_24] : memref<72x512xbf16, #tpu.memory_space<vmem>>, vector<8x490xbf16>
    tpu.vector_store %arg6[%c40, %c0_24], %18 {strides = array<i32>} : memref<72x512xbf16, #tpu.memory_space<vmem>>, vector<8x490xbf16>,
    %c0_25 = arith.constant 0 : index
    %c0_26 = arith.constant 0 : index
    %20 = vector.load %arg2[%c0_25, %c0_26] : memref<8x128xbf16, #tpu.memory_space<vmem>>, vector<8x22xbf16>
    %c40_27 = arith.constant 40 : index
    %c490 = arith.constant 490 : index
    %21 = vector.load %arg6[%c40_27, %c490] : memref<72x512xbf16, #tpu.memory_space<vmem>>, vector<8x22xbf16>
    tpu.vector_store %arg6[%c40_27, %c490], %20 {strides = array<i32>} : memref<72x512xbf16, #tpu.memory_space<vmem>>, vector<8x22xbf16>,
    %c0_28 = arith.constant 0 : index
    %c40_29 = arith.constant 40 : index
    %22 = vector.load %arg1[%c0_28, %c40_29] : memref<8x512xbf16, #tpu.memory_space<vmem>>, vector<8x472xbf16>
    %c48 = arith.constant 48 : index
    %c0_30 = arith.constant 0 : index
    %23 = vector.load %arg6[%c48, %c0_30] : memref<72x512xbf16, #tpu.memory_space<vmem>>, vector<8x472xbf16>
    tpu.vector_store %arg6[%c48, %c0_30], %22 {strides = array<i32>} : memref<72x512xbf16, #tpu.memory_space<vmem>>, vector<8x472xbf16>,
    %c0_31 = arith.constant 0 : index
    %c0_32 = arith.constant 0 : index
    %24 = vector.load %arg2[%c0_31, %c0_32] : memref<8x128xbf16, #tpu.memory_space<vmem>>, vector<8x40xbf16>
    %c48_33 = arith.constant 48 : index
    %c472 = arith.constant 472 : index
    %25 = vector.load %arg6[%c48_33, %c472] : memref<72x512xbf16, #tpu.memory_space<vmem>>, vector<8x40xbf16>
    tpu.vector_store %arg6[%c48_33, %c472], %24 {strides = array<i32>} : memref<72x512xbf16, #tpu.memory_space<vmem>>, vector<8x40xbf16>,
    %c0_34 = arith.constant 0 : index
    %c41 = arith.constant 41 : index
    %26 = vector.load %arg1[%c0_34, %c41] : memref<8x512xbf16, #tpu.memory_space<vmem>>, vector<8x471xbf16>
    %c56 = arith.constant 56 : index
    %c0_35 = arith.constant 0 : index
    %27 = vector.load %arg6[%c56, %c0_35] : memref<72x512xbf16, #tpu.memory_space<vmem>>, vector<8x471xbf16>
    tpu.vector_store %arg6[%c56, %c0_35], %26 {strides = array<i32>} : memref<72x512xbf16, #tpu.memory_space<vmem>>, vector<8x471xbf16>,
    %c0_36 = arith.constant 0 : index
    %c0_37 = arith.constant 0 : index
    %28 = vector.load %arg2[%c0_36, %c0_37] : memref<8x128xbf16, #tpu.memory_space<vmem>>, vector<8x41xbf16>
    %c56_38 = arith.constant 56 : index
    %c471 = arith.constant 471 : index
    %29 = vector.load %arg6[%c56_38, %c471] : memref<72x512xbf16, #tpu.memory_space<vmem>>, vector<8x41xbf16>
    tpu.vector_store %arg6[%c56_38, %c471], %28 {strides = array<i32>} : memref<72x512xbf16, #tpu.memory_space<vmem>>, vector<8x41xbf16>,
    %c0_39 = arith.constant 0 : index
    %c42 = arith.constant 42 : index
    %30 = vector.load %arg1[%c0_39, %c42] : memref<8x512xbf16, #tpu.memory_space<vmem>>, vector<8x470xbf16>
    %c64 = arith.constant 64 : index
    %c0_40 = arith.constant 0 : index
    %31 = vector.load %arg6[%c64, %c0_40] : memref<72x512xbf16, #tpu.memory_space<vmem>>, vector<8x470xbf16>
    tpu.vector_store %arg6[%c64, %c0_40], %30 {strides = array<i32>} : memref<72x512xbf16, #tpu.memory_space<vmem>>, vector<8x470xbf16>,
    %c0_41 = arith.constant 0 : index
    %c0_42 = arith.constant 0 : index
    %32 = vector.load %arg2[%c0_41, %c0_42] : memref<8x128xbf16, #tpu.memory_space<vmem>>, vector<8x42xbf16>
    %c64_43 = arith.constant 64 : index
    %c470 = arith.constant 470 : index
    %33 = vector.load %arg6[%c64_43, %c470] : memref<72x512xbf16, #tpu.memory_space<vmem>>, vector<8x42xbf16>
    tpu.vector_store %arg6[%c64_43, %c470], %32 {strides = array<i32>} : memref<72x512xbf16, #tpu.memory_space<vmem>>, vector<8x42xbf16>,
    %c0_44 = arith.constant 0 : index
    %c0_45 = arith.constant 0 : index
    %34 = vector.load %arg3[%c0_44, %c0_45] : memref<8x72xbf16, #tpu.memory_space<vmem>>, vector<8x72xbf16>
    %c0_46 = arith.constant 0 : index
    %c0_47 = arith.constant 0 : index
    %35 = vector.load %arg6[%c0_46, %c0_47] : memref<72x512xbf16, #tpu.memory_space<vmem>>, vector<72x512xbf16>
    %cst = arith.constant dense<0.000000e+00> : vector<8x512xf32>
    %36 = tpu.matmul %34, %35, %cst {dimension_numbers = #tpu.dot_dimension_numbers<[1], [0], [0], [1], [0, 0, 1, 1], [], []>} : vector<8x72xbf16>, vector<72x512xbf16>, vector<8x512xf32> -> vector<8x512xf32>
    %c0_48 = arith.constant 0 : index
    %c0_49 = arith.constant 0 : index
    %37 = vector.load %arg4[%c0_48, %c0_49] : memref<8x1xf32, #tpu.memory_space<vmem>>, vector<8x1xf32>
    %38 = vector.broadcast %37 : vector<8x1xf32> to vector<8x512xf32>
    %39 = arith.addf %36, %38 : vector<8x512xf32>
    %c0_50 = arith.constant 0 : index
    %c0_51 = arith.constant 0 : index
    %40 = vector.load %arg5[%c0_50, %c0_51] : memref<8x512xf32, #tpu.memory_space<vmem>>, vector<8x512xf32>
    tpu.vector_store %arg5[%c0_50, %c0_51], %39 {strides = array<i32>} : memref<8x512xf32, #tpu.memory_space<vmem>>, vector<8x512xf32>,
    return
  }
  func.func @transform_0(%arg0: i32) -> (i32, i32) {
    %c0_i32 = arith.constant 0 : i32
    %c0_i32_0 = arith.constant 0 : i32
    return %c0_i32, %arg0 : i32, i32
  }
  func.func @transform_1(%arg0: i32) -> (i32, i32) {
    %c1_i32 = arith.constant 1 : i32
    %0 = arith.addi %arg0, %c1_i32 : i32
    %c4_i32 = arith.constant 4 : i32
    %1 = arith.muli %0, %c4_i32 : i32
    %c0_i32 = arith.constant 0 : i32
    %c0_i32_0 = arith.constant 0 : i32
    return %c0_i32, %1 : i32, i32
  }
  func.func @transform_2(%arg0: i32) -> (i32, i32) {
    %c0_i32 = arith.constant 0 : i32
    %c0_i32_0 = arith.constant 0 : i32
    %c0_i32_1 = arith.constant 0 : i32
    return %c0_i32, %c0_i32_0 : i32, i32
  }
  func.func @transform_3(%arg0: i32) -> (i32, i32) {
    %c0_i32 = arith.constant 0 : i32
    %c0_i32_0 = arith.constant 0 : i32
    %c0_i32_1 = arith.constant 0 : i32
    return %c0_i32, %c0_i32_0 : i32, i32
  }
  func.func @transform_4(%arg0: i32) -> (i32, i32) {
    %c0_i32 = arith.constant 0 : i32
    %c0_i32_0 = arith.constant 0 : i32
    return %c0_i32, %arg0 : i32, i32
  }
}

</mosaic_0001>

<bundles_post_ra>
// kernel: tpu_custom_call.1
= control target key start
LH: loop header
LB: loop body
LE: loop exit
PB: predicated region body
PF: predicated region fallthrough
CT: control target
= control target key end

     0   :  { %s1471_s0 = inlined_call_operand.hbm [shape: bf16[8,1536], index: 0, kind: input, shape index: {}]   ;;  %s1472_s1 = inlined_call_operand.hbm [shape: bf16[8,1536], index: 1, kind: input, shape index: {}]   ;;  %s1473_s2 = inlined_call_operand.vmem [shape: bf16[8,72], index: 2, kind: input, shape index: {}]   ;;  %s1474_s3 = inlined_call_operand.vmem [shape: f32[8,1], index: 3, kind: input, shape index: {}]   ;;  %s1475_s4 = inlined_call_operand.hbm [shape: f32[8,1024], index: 4, kind: output, shape index: {}]  }
   0x1   :  { %1482 = sst [smem:[#allocation12_spill]] %s1471_s0 }
   0x2   :  { %9 = vsyncpa [#allocation4], 0 }
   0x3   :  { %11 = vsyncpa [#allocation4 + $0x1], 0 }
   0x4   :  { %12 = vsyncpa [#allocation7], 0 }
   0x5   :  { %14 = vsyncpa [#allocation7 + $0x1], 0 }
   0x6   :  { %15 = vsyncpa [#allocation5], 0 }
   0x7   :  { %17 = vsyncpa [#allocation5 + $0x1], 0  ;;  %s1149_s15 = smov 0   ;;  %s1151_s16 = smov 0  }
   0x8   :  { %s1153_s17 = smov 0   ;;  %s1155_s18 = smov 0  }
   0x9   :  { %s1157_s19 = smov 0   ;;  %s1159_s20 = smov 0  }
   0xa   :  { %s1161_s21 = smov 0  }
   0xb LB: > { %s1185_s22 = sadd.s32 4294967295, %s1110_s21   ;;  %s810_s23 = sadd.s32 4294967294, %s1110_s21   ;;  %s1110_s21 = sphi %s1161_s21, %s1508_s21   ;;  %s1106_s20 = sphi %s1159_s20, %s1507_s20   ;;  %s1102_s19 = sphi %s1157_s19, %s1506_s19   ;;  %s1098_s18 = sphi %s1155_s18, %s1505_s18   ;;  %s1094_s17 = sphi %s1153_s17, %s1504_s17   ;;  %s1090_s16 = sphi %s1151_s16, %s1503_s16   ;;  %s1086_s15 = sphi %s1149_s15, %s1502_s15  }
   0xc   : > { %s1189_s24 = sadd.s32 1, %s1110_s21   ;;  %s30_s25 = sadd.s32 1, %s1106_s20 }
   0xd   : > { %s27_s26 = ssub.s32 %s1110_s21, %s1189_s24  ;;  %p37_p0 = scmp.ne.s32.totalorder %s1106_s20, %s1102_s19 }
   0xe   : > { %p28_p1 = scmp.eq.s32.totalorder %s27_s26, 0  ;;  %p1478_p2 = scmp.eq.s32.totalorder %s1110_s21, 0 }
   0xf   : > { %p43_p3 = scmp.ne.s32.totalorder %s1102_s19, %s1098_s18  ;;  %p1477_p4 = scmp.eq.s32.totalorder %s1185_s22, 0 }
  0x10   : > { %s1201_s27 = scalar_select %p28_p1, %s1106_s20, %s30_s25  }
  0x11   : > { %p1205_p5 = por %p1478_p2, %p37_p0  ;;  %p1211_p6 = por %p1477_p4, %p43_p3 }
  0x12   : > { %p139_p7 = scmp.eq.s32.totalorder %s1185_s22, 1  ;;  %p145_p8 = scmp.eq.s32.totalorder %s810_s23, 1 }
  0x13   : > { %s1484_s29 = scalar_select %p1211_p6, 1, 0 }
  0x14   : > { %p1476_p10 = scmp.lt.s32.totalorder %s1110_s21, 2  ;;  %p1218_p11 = por %p139_p7, %p37_p0 }
  0x15   : > { %p1222_p12 = por %p145_p8, %p43_p3  ;;  %s171_s6 = sand.u32 1, %s1106_s20  }
  0x16   : > { %s1485_s30 = scalar_select %p1218_p11, 1, 0 }
  0x17   : > { %s1486_s5 = scalar_select %p1222_p12, 1, 0 }
  0x18   : > { %s857_s7 = sshll.u32 %s1110_s21, 8  ;;  %s815_s8 = sshll.u32 %s171_s6, 4 }
  0x19   : > { %s1487_s0 = sld [smem:[#allocation12_spill]]  ;;  %s175_s12 = scalar_lea.vmem [#allocation3], %s815_s8 }
  0x1a   : > { %s183_s13 = sshll.u32 %s175_s12, 4  ;;  %p1239_p13 = pnand %p1476_p10, %p1205_p5  ;;  %s1243_s13 = int_to_ptr.vmem [resolvable:$true] %s183_s13 }
  0x1b   : > { %s172_s23 = scalar_lea.sflag [#allocation4], %s171_s6 }
  0x1c   : > { %p957_p7 = pneg %p1239_p13 }
  0x1f   : > { %s1233_s11 = scalar_lea.hbm %s1487_s0, %s857_s7  ;;  %s960_s8 = scalar_lea.hbm %s1487_s0, 768 }
  0x20   : > { %s955_s25 = scalar_lea.hbm %s1233_s11, 256  ;;  %p961_p5 = scmp.lt.u32.totalorder %s1233_s11, %s1487_s0 }
  0x21   : > { %p956_p3 = scmp.ne.s32.totalorder %s1233_s11, %s955_s25  ;;  %p962_p10 = scmp.lt.u32.totalorder %s960_s8, %s955_s25 }
  0x22   : > { %p964_p2 = scmp.lt.u32.totalorder %s955_s25, %s1233_s11 }
  0x23   : > { %p958_p8 = pnand %p957_p7, %p956_p3  ;;  %p963_p4 = por %p962_p10, %p961_p5 }
  0x25   : > { %p959_p9 = pneg %p958_p8  ;;  %p965_p0 = por %p964_p2, %p963_p4 }
  0x27   : > { %p966_p1 = pnand %p965_p0, %p959_p9 }
  0x29   : > { %969 = shalt.err (!%p966_p1)
}
  0x2a   : > { %s970_s6 = scalar_lea.vmem %s1243_s13, 256  ;;  %s1112_s12 = smov [#allocation3]  }
  0x2b   : > { %p971_p3 = scmp.ne.s32.totalorder %s1243_s13, %s970_s6  ;;  %s975_s26 = sshll.u32 %s1112_s12, 4  ;;  %s976_s26 = int_to_ptr.vmem [resolvable:$false] %s975_s26 }
  0x2c   : > { %s977_s28 = scalar_lea.vmem %s976_s26, 512  ;;  %p978_p11 = scmp.lt.s32.totalorder %s1243_s13, %s976_s26 }
  0x2d   : > { %p973_p8 = pnand %p971_p3, %p957_p7  ;;  %p979_p10 = scmp.lt.s32.totalorder %s977_s28, %s970_s6 }
  0x2f   : > { %p974_p12 = pneg %p973_p8  ;;  %p980_p5 = por %p979_p10, %p978_p11 }
  0x31   : > { %p981_p2 = pnand %p980_p5, %p974_p12 }
  0x33   : > { %984 = shalt.err (!%p981_p2)
}
  0x34   : > { %870 = dma.hbm_to_vmem [thread:$0]  (!%p1239_p13), %s1233_s11, 256, %s1243_s13, %s172_s23  }
  0x35   : > { %p1489_p4 = scmp.lt.s32.totalorder %s1110_s21, 3  ;;  %p1490_p9 = scmp.ge.s32.totalorder %s1110_s21, 1 }
  0x36   : > { %s853_s25 = sshll.u32 %s1110_s21, 2  ;;  %s60_s9 = sadd.s32 1, %s1094_s17 }
  0x37   : > { %p1276_p11 = pnand %p1490_p9, %p1489_p4  ;;  %s854_s8 = sadd.s32 4, %s853_s25 }
  0x38   : > { %s856_s10 = sadd.s32 4, %s854_s8  ;;  %p67_p12 = scmp.ne.s32.totalorder %s1094_s17, %s1090_s16 }
  0x39   : > { %s57_s6 = ssub.s32 %s854_s8, %s856_s10  ;;  %p73_p0 = scmp.ne.s32.totalorder %s1090_s16, %s1086_s15 }
  0x3a   : > { %p58_p1 = scmp.eq.s32.totalorder %s57_s6, 0  ;;  %p1492_p7 = scmp.eq.s32.totalorder %s1110_s21, 0 }
  0x3b   : > { %p1493_p8 = scmp.eq.s32.totalorder %s1185_s22, 0  ;;  %s190_s13 = sand.u32 1, %s1094_s17  }
  0x3c   : > { %p69_p3 = por %p67_p12, %p1492_p7  ;;  %s818_s12 = sshll.u32 %s190_s13, 2 }
  0x3d   : > { %p1290_p10 = por %p73_p0, %p1493_p8  ;;  %s752_s25 = scalar_lea.hbm %s1472_s1, %s857_s7 }
  0x3e   : > { %s1296_s23 = scalar_select %p58_p1, %s1094_s17, %s60_s9  }
  0x3f   : > { %s1494_s11 = scalar_select %p1290_p10, 1, 0 }
  0x40   : > { %s1303_s0 = scalar_lea.hbm %s752_s25, 256  ;;  %s194_s15 = scalar_lea.vmem [#allocation6], %s818_s12 }
  0x41   : > { %s203_s8 = sshll.u32 %s194_s15, 4  ;;  %p1495_p13 = scmp.lt.s32.totalorder %s1110_s21, 2  ;;  %s1305_s8 = int_to_ptr.vmem [resolvable:$true] %s203_s8 }
  0x42   : > { %s191_s9 = scalar_lea.sflag [#allocation7], %s190_s13  ;;  %s1015_s6 = scalar_lea.hbm %s752_s25, 320 }
  0x43   : > { %p1309_p5 = pnand %p1495_p13, %p69_p3  ;;  %p986_p2 = scmp.ne.s32.totalorder %s1303_s0, %s1015_s6 }
  0x44   : > { %s990_s26 = scalar_lea.hbm %s1472_s1, 768  ;;  %p991_p0 = scmp.lt.u32.totalorder %s1303_s0, %s1472_s1 }
  0x45   : > { %p987_p4 = pneg %p1309_p5  ;;  %p992_p1 = scmp.lt.u32.totalorder %s990_s26, %s1015_s6 }
  0x46   : > { %p994_p3 = scmp.lt.u32.totalorder %s1015_s6, %s1303_s0 }
  0x47   : > { %p988_p9 = pnand %p987_p4, %p986_p2  ;;  %p993_p7 = por %p992_p1, %p991_p0 }
  0x49   : > { %p989_p12 = pneg %p988_p9  ;;  %p995_p8 = por %p994_p3, %p993_p7 }
  0x4b   : > { %p996_p13 = pnand %p995_p8, %p989_p12 }
  0x4d   : > { %999 = shalt.err (!%p996_p13)
}
  0x4e   : > { %s1000_s13 = scalar_lea.vmem %s1305_s8, 64  ;;  %s1113_s25 = smov [#allocation6]  }
  0x4f   : > { %p1001_p2 = scmp.ne.s32.totalorder %s1305_s8, %s1000_s13  ;;  %s1005_s7 = sshll.u32 %s1113_s25, 4  ;;  %s1006_s7 = int_to_ptr.vmem [resolvable:$false] %s1005_s7 }
  0x50   : > { %s1007_s12 = scalar_lea.vmem %s1006_s7, 128  ;;  %p1008_p6 = scmp.lt.s32.totalorder %s1305_s8, %s1006_s7 }
  0x51   : > { %p1003_p9 = pnand %p1001_p2, %p987_p4  ;;  %p1009_p0 = scmp.lt.s32.totalorder %s1007_s12, %s1000_s13 }
  0x53   : > { %p1004_p10 = pneg %p1003_p9  ;;  %p1010_p1 = por %p1009_p0, %p1008_p6 }
  0x55   : > { %p1011_p7 = pnand %p1010_p1, %p1004_p10 }
  0x57   : > { %1014 = shalt.err (!%p1011_p7)
}
  0x58   : > { %873 = dma.hbm_to_vmem [thread:$0]  (!%p1309_p5), %s1303_s0, 64, %s1305_s8, %s191_s9  }
  0x59   : > { %212 = sbr.rel (%p1276_p11) target bundleno = 509 (0x1fd), region = 36  ;;  %s1340_s6 = sand.u32 (!%p1276_p11), 1, %s1102_s19  }
  0x5a   : > { %s821_s26 = sshll.u32 (!%p1276_p11), %s1340_s6, 4  ;;  %s215_s28 = scalar_lea.sflag (!%p1276_p11), [#allocation4], %s1340_s6 }
  0x5b   : > { %s218_s15 = scalar_lea.vmem (!%p1276_p11), [#allocation3], %s821_s26  ;;  %p1497_p6 = scmp.ne.s32.totalorder (!%p1276_p11), %s1484_s29, 0 }
  0x60   : > { %1073 = dma.done.wait (%p1497_p6), %s215_s28, 256  }
  0x61   : > { %1075 = vsyncadd (%p1497_p6), %s215_s28, 4294967040  ;;  %s223_s0 = sand.u32 1, %s1090_s16   ;;  %p1498_p11 = scmp.ne.s32.totalorder %s1494_s11, 0 }
  0x62   : > { %s822_s8 = sshll.u32 %s223_s0, 2  ;;  %s224_s14 = scalar_lea.sflag [#allocation7], %s223_s0 }
  0x63   : > { %s1349_s10 = scalar_lea.vmem [#allocation6], %s822_s8 }
  0x64   : > { %1077 = dma.done.wait (%p1498_p11), %s224_s14, 64  }
  0x65   : > { %1079 = vsyncadd (%p1498_p11), %s224_s14, 4294967232  ;;  %v288_v0 = vld [vmem:[%s1349_s10] sm:$0xf]  ;;  %v1358_v2 = vld [vmem:[%s218_s15 + $0x8] sm:$0xff]  ;;  %s1114_s29 = smov 127   ;;  %s1115_s9 = smov 126  }
  0x66   : > { %v1356_v1 = vld [vmem:[%s218_s15] sm:$0xff]  ;;  %290 = vrot.lane.b32.xlu1 %v288_v0, %s1114_s29  ;;  %s1116_s11 = smov 108   ;;  %s1117_s13 = smov 107   ;;  %v1122_v10 = vmov 0   ;;  %vm276_vm0 = vcmask 1043456   ;;  %vm285_vm1 = vcmask 1039364  }
  0x67   : > { %270 = vrot.lane.b32.xlu0 %v1356_v1, %s1114_s29  ;;  %v315_v3 = vld [vmem:[%s1349_s10] sm:$0xf]  ;;  %s1118_s25 = smov 106   ;;  %s1119_s7 = smov 88   ;;  %647 = vmatprep.mubr.bf16.mxu0 %v1122_v10  ;;  %v503_v11 = vld [vmem:[%s1474_s3] sm:$0xff]  ;;  %vm278_vm2 = vcmask 1039360   ;;  %vm286_vm3 = vmor %vm285_vm1, %vm276_vm0 }
  0x68   : > { %v342_v4 = vld [vmem:[%s1349_s10] sm:$0xf]  ;;  %s1120_s12 = smov 87   ;;  %s1121_s26 = smov 86   ;;  %688 = vmatprep.mubr.bf16.mxu1 %v1122_v10  ;;  %945 = vset.pattern.permute.xlu0 %v1122_v10  ;;  %vm293_vm4 = vcmask 1044472   ;;  %vm312_vm5 = vcmask 1031172  }
  0x69   : > { %v369_v5 = vld [vmem:[%s1349_s10] sm:$0xf]  ;;  %vm306_vm6 = vcmask 1031168   ;;  %vm313_vm7 = vmor %vm312_vm5, %vm276_vm0  ;;  %vm320_vm8 = vcmask 1044464   ;;  %vm339_vm9 = vcmask 883716   ;;  %vm333_vm10 = vcmask 883712  }
  0x6a   : > { %299 = vrot.lane.b32.xlu1 %v1356_v1, %s1115_s9  ;;  %v396_v6 = vld [vmem:[%s1349_s10] sm:$0xf]  ;;  %vm340_vm11 = vmor %vm339_vm9, %vm276_vm0  ;;  %vm347_vm12 = vcmask 1044320   ;;  %vm366_vm13 = vcmask 875524   ;;  %vm360_vm14 = vcmask 875520   ;;  %vm374_vm1 = vcmask 1044312  }
  0x6b   : > { %272 = vrot.lane.b32.xlu0 %v1358_v2, %s1114_s29  ;;  %v423_v7 = vld [vmem:[%s1349_s10] sm:$0xf]  ;;  %vm367_vm15 = vmor %vm366_vm13, %vm276_vm0  ;;  %vm401_vm5 = vcmask 1044304   ;;  %vm428_vm9 = vcmask 1044160   ;;  %vm455_vm13 = vcmask 1044152   ;;  %s823_s14 = sshll.u32 %s1340_s6, 5 }
  0x6c   : > { %v450_v8 = vld [vmem:[%s1349_s10] sm:$0xf]  ;;  %s858_s29 = sshll.u32 %s1185_s22, 9  ;;  %s702_s22 = scalar_lea.sflag [#allocation5], %s1340_s6 }
  0x6d   : > { %v477_v9 = vld [vmem:[%s1349_s10] sm:$0xf]  ;;  %s256_s10 = scalar_lea.vmem [#allocation8], %s823_s14  ;;  %p1499_p5 = scmp.ne.s32.totalorder %s1485_s30, 0 }
  0x6e   : > { %326 = vrot.lane.b32.xlu1 %v1356_v1, %s1116_s11 }
  0x6f   : > { %301 = vrot.lane.b32.xlu0 %v1358_v2, %s1115_s9 }
  0x72   : > { %317 = vrot.lane.b32.xlu1 %v315_v3, %s1115_s9  ;;  %s716_s9 = sshll.u32 %s256_s10, 4  ;;  %s1420_s9 = int_to_ptr.vmem [resolvable:$true] %s716_s9 }
  0x73   : > { %328 = vrot.lane.b32.xlu0 %v1358_v2, %s1116_s11 }
  0x76   : > { %353 = vrot.lane.b32.xlu1 %v1356_v1, %s1117_s13 }
  0x77   : > { %344 = vrot.lane.b32.xlu0 %v342_v4, %s1116_s11 }
  0x7a   : > { %380 = vrot.lane.b32.xlu1 %v1356_v1, %s1118_s25 }
  0x7b   : > { %355 = vrot.lane.b32.xlu0 %v1358_v2, %s1117_s13 }
  0x7e   : > { %371 = vrot.lane.b32.xlu1 %v369_v5, %s1117_s13 }
  0x7f   : > { %382 = vrot.lane.b32.xlu0 %v1358_v2, %s1118_s25 }
  0x82   : > { %407 = vrot.lane.b32.xlu1 %v1356_v1, %s1119_s7 }
  0x83   : > { %398 = vrot.lane.b32.xlu0 %v396_v6, %s1118_s25  ;;  %s1418_s25 = scalar_lea.hbm %s1475_s4, %s858_s29 }
  0x86   : > { %434 = vrot.lane.b32.xlu1 %v1356_v1, %s1120_s12 }
  0x87   : > { %409 = vrot.lane.b32.xlu0 %v1358_v2, %s1119_s7 }
  0x8a   : > { %425 = vrot.lane.b32.xlu1 %v423_v7, %s1119_s7  ;;  %s1016_s7 = scalar_lea.vmem %s1420_s9, 512 }
  0x8b   : > { %436 = vrot.lane.b32.xlu0 %v1358_v2, %s1120_s12  ;;  %p1017_p10 = scmp.ne.s32.totalorder %s1420_s9, %s1016_s7 }
  0x8d   : > { %p1018_p4 = pnand %p1017_p10, %p1499_p5 }
  0x8e   : > { %461 = vrot.lane.b32.xlu1 %v1356_v1, %s1121_s26 }
  0x8f   : > { %452 = vrot.lane.b32.xlu0 %v450_v8, %s1120_s12  ;;  %p1019_p12 = pneg %p1018_p4  ;;  %s1123_s12 = smov [#allocation8]  }
  0x92   : > { %479 = vrot.lane.b32.xlu1 %v477_v9, %s1121_s26 }
  0x93   : > { %463 = vrot.lane.b32.xlu0 %v1358_v2, %s1121_s26  ;;  %s1020_s26 = sshll.u32 %s1123_s12, 4  ;;  %s1021_s26 = int_to_ptr.vmem [resolvable:$false] %s1020_s26 }
  0x94   : > { %s1022_s28 = scalar_lea.vmem %s1021_s26, 1024  ;;  %p1023_p3 = scmp.lt.s32.totalorder %s1420_s9, %s1021_s26 }
  0x95   : > { %p1024_p8 = scmp.lt.s32.totalorder %s1022_s28, %s1016_s7 }
  0x97   : > { %506 = vperm.xlu0 %945, %v503_v11   ;;  %p1025_p13 = por %p1024_p8, %p1023_p3 }
  0x99   : > { %p1026_p2 = pnand %p1025_p13, %p1019_p12 }
  0xd8   : > { %v291_v12 = vpop.permute.xlu1 %290 }
  0xd9   : > { %v271_v13 = vpop.permute.xlu0 %270 }
  0xda   : > { %v274_v16 = vrot.slane %v271_v13, 4 }
  0xdc   : > { %v300_v14 = vpop.permute.xlu1 %299 }
  0xdd   : > { %v273_v15 = vpop.permute.xlu0 %272  ;;  %v303_v18 = vrot.slane %v300_v14, 4 }
  0xde   : > { %v275_v17 = vrot.slane %v273_v15, 4 }
  0xe0   : > { %v277_v19 = vsel %vm276_vm0, %v274_v16, %v275_v17  ;;  %v280_v20 = vsel %vm278_vm2, %v273_v15, %v275_v17  ;;  %v327_v22 = vpop.permute.xlu1 %326 }
  0xe1   : > { %v279_v21 = vsel %vm278_vm2, %v271_v13, %v277_v19  ;;  %287 = vst.msk [vmem:[#allocation2 + $0x18] sm:$0xff] %vm286_vm3, %v280_v20  ;;  %v302_v23 = vpop.permute.xlu0 %301  ;;  %v330_v27 = vrot.slane %v327_v22, 4  ;;  %vm393_vm2 = vcmask 867332   ;;  %vm387_vm3 = vcmask 867328  }
  0xe2   : > { %294 = vst.msk [vmem:[#allocation2 + $0x1c] sm:$0xf] %vm293_vm4, %v291_v12  ;;  %v304_v24 = vrot.slane %v302_v23, 4  ;;  %v825_v25 = vcombine.high %v1356_v1, %v279_v21  ;;  %v824_v26 = vcombine.low %v1356_v1, %v279_v21  ;;  %vm394_vm4 = vmor %vm393_vm2, %vm276_vm0  ;;  %vm482_vm2 = vcmask 1044144  }
  0xe4   : > { %v305_v28 = vsel %vm276_vm0, %v303_v18, %v304_v24  ;;  %v308_v29 = vsel %vm306_vm6, %v302_v23, %v304_v24  ;;  %615 = vmatprep.subr.bf16.mxu0 %v825_v25  ;;  %v318_v31 = vpop.permute.xlu1 %317 }
  0xe5   : > { %v307_v30 = vsel %vm306_vm6, %v300_v14, %v305_v28  ;;  %314 = vst.msk [vmem:[#allocation2 + $0x28] sm:$0xff] %vm313_vm7, %v308_v29  ;;  %v329_v32 = vpop.permute.xlu0 %328  ;;  %616 = vmatpush1.bf16.msra.mxu0 %v824_v26  ;;  %vm420_vm6 = vcmask 719876   ;;  %vm414_vm7 = vcmask 719872  }
  0xe6   : > { %321 = vst.msk [vmem:[#allocation2 + $0x2c] sm:$0xf] %vm320_vm8, %v318_v31  ;;  %v331_v33 = vrot.slane %v329_v32, 4  ;;  %vm421_vm8 = vmor %vm420_vm6, %vm276_vm0 }
  0xe8   : > { %v332_v34 = vsel %vm276_vm0, %v330_v27, %v331_v33  ;;  %v335_v35 = vsel %vm333_vm10, %v329_v32, %v331_v33  ;;  %v354_v37 = vpop.permute.xlu1 %353 }
  0xe9   : > { %v334_v36 = vsel %vm333_vm10, %v327_v22, %v332_v34  ;;  %341 = vst.msk [vmem:[#allocation2 + $0x38] sm:$0xff] %vm340_vm11, %v335_v35  ;;  %v345_v38 = vpop.permute.xlu0 %344  ;;  %v488_v39 = vld [vmem:[#allocation2 + $0x18] sm:$0xff]  ;;  %v357_v44 = vrot.slane %v354_v37, 4  ;;  %vm447_vm10 = vcmask 711684   ;;  %vm441_vm11 = vcmask 711680  }
  0xea   : > { %348 = vst.msk [vmem:[#allocation2 + $0x3c] sm:$0xf] %vm347_vm12, %v345_v38  ;;  %v827_v40 = vcombine.high %v1358_v2, %v488_v39  ;;  %v826_v41 = vcombine.low %v1358_v2, %v488_v39  ;;  %v829_v42 = vcombine.high %v307_v30, %v334_v36  ;;  %v828_v43 = vcombine.low %v307_v30, %v334_v36  ;;  %vm448_vm12 = vmor %vm447_vm10, %vm276_vm0  ;;  %v484_v36 = vld [vmem:[%s1473_s2] sm:$0xf] }
  0xec   : > { %656 = vmatprep.subr.bf16.mxu1 %v827_v40  ;;  %617 = vmatprep.subr.bf16.mxu0 %v829_v42  ;;  %v381_v45 = vpop.permute.xlu1 %380 }
  0xed   : > { %v356_v46 = vpop.permute.xlu0 %355  ;;  %657 = vmatpush1.bf16.msra.mxu1 %v826_v41  ;;  %618 = vmatpush1.bf16.msra.mxu0 %v828_v43  ;;  %v384_v48 = vrot.slane %v381_v45, 4  ;;  %v490_v54 = vld [vmem:[#allocation2 + $0x28] sm:$0xff] }
  0xee   : > { %v358_v47 = vrot.slane %v356_v46, 4 }
  0xf0   : > { %v359_v49 = vsel %vm276_vm0, %v357_v44, %v358_v47  ;;  %v362_v50 = vsel %vm360_vm14, %v356_v46, %v358_v47  ;;  %v372_v52 = vpop.permute.xlu1 %371 }
  0xf1   : > { %v361_v51 = vsel %vm360_vm14, %v354_v37, %v359_v49  ;;  %368 = vst.msk [vmem:[#allocation2 + $0x48] sm:$0xff] %vm367_vm15, %v362_v50  ;;  %v383_v53 = vpop.permute.xlu0 %382  ;;  %v492_v55 = vld [vmem:[#allocation2 + $0x38] sm:$0xff]  ;;  %vm474_vm14 = vcmask 703492   ;;  %vm468_vm15 = vcmask 703488  }
  0xf2   : > { %v946_v56 = vld [vmem:[#allocation2 + $0x2c] ss:$16 sps:$4 sm:$0xff]   ;;  %375 = vst.msk [vmem:[#allocation2 + $0x4c] sm:$0xf] %vm374_vm1, %v372_v52  ;;  %v385_v57 = vrot.slane %v383_v53, 4  ;;  %v830_v58 = vcombine.low %v490_v54, %v492_v55  ;;  %vm475_vm1 = vmor %vm474_vm14, %vm276_vm0 }
  0xf3   : > { %658 = vmatprep.subr.bf16.mxu1 %v946_v56 }
  0xf4   : > { %v386_v59 = vsel %vm276_vm0, %v384_v48, %v385_v57  ;;  %v389_v60 = vsel %vm387_vm3, %v383_v53, %v385_v57  ;;  %659 = vmatpush1.bf16.msra.mxu1 %v830_v58  ;;  %v408_v62 = vpop.permute.xlu1 %407 }
  0xf5   : > { %v388_v61 = vsel %vm387_vm3, %v381_v45, %v386_v59  ;;  %395 = vst.msk [vmem:[#allocation2 + $0x58] sm:$0xff] %vm394_vm4, %v389_v60  ;;  %v399_v63 = vpop.permute.xlu0 %398  ;;  %v411_v2 = vrot.slane %v408_v62, 4  ;;  %vm599_vm3 = vcmask 588800  }
  0xf6   : > { %402 = vst.msk [vmem:[#allocation2 + $0x5c] sm:$0xf] %vm401_vm5, %v399_v63  ;;  %v833_v0 = vcombine.high %v361_v51, %v388_v61  ;;  %v832_v1 = vcombine.low %v361_v51, %v388_v61 }
  0xf8   : > { %619 = vmatprep.subr.bf16.mxu0 %v833_v0  ;;  %v435_v3 = vpop.permute.xlu1 %434 }
  0xf9   : > { %v410_v4 = vpop.permute.xlu0 %409  ;;  %620 = vmatpush1.bf16.msra.mxu0 %v832_v1  ;;  %v438_v6 = vrot.slane %v435_v3, 4  ;;  %v494_v12 = vld [vmem:[#allocation2 + $0x48] sm:$0xff] }
  0xfa   : > { %v412_v5 = vrot.slane %v410_v4, 4 }
  0xfc   : > { %v413_v7 = vsel %vm276_vm0, %v411_v2, %v412_v5  ;;  %v416_v8 = vsel %vm414_vm7, %v410_v4, %v412_v5  ;;  %v426_v10 = vpop.permute.xlu1 %425 }
  0xfd   : > { %v415_v9 = vsel %vm414_vm7, %v408_v62, %v413_v7  ;;  %422 = vst.msk [vmem:[#allocation2 + $0x68] sm:$0xff] %vm421_vm8, %v416_v8  ;;  %v437_v11 = vpop.permute.xlu0 %436  ;;  %v496_v13 = vld [vmem:[#allocation2 + $0x58] sm:$0xff] }
  0xfe   : > { %v948_v14 = vld [vmem:[#allocation2 + $0x4c] ss:$16 sps:$4 sm:$0xff]   ;;  %429 = vst.msk [vmem:[#allocation2 + $0x6c] sm:$0xf] %vm428_vm9, %v426_v10  ;;  %v439_v15 = vrot.slane %v437_v11, 4  ;;  %v834_v16 = vcombine.low %v494_v12, %v496_v13 }
  0xff   : > { %660 = vmatprep.subr.bf16.mxu1 %v948_v14 }
 0x100   : > { %v440_v17 = vsel %vm276_vm0, %v438_v6, %v439_v15  ;;  %v443_v18 = vsel %vm441_vm11, %v437_v11, %v439_v15  ;;  %661 = vmatpush1.bf16.msra.mxu1 %v834_v16  ;;  %v462_v21 = vpop.permute.xlu1 %461 }
 0x101   : > { %v442_v19 = vsel %vm441_vm11, %v435_v3, %v440_v17  ;;  %449 = vst.msk [vmem:[#allocation2 + $0x78] sm:$0xff] %vm448_vm12, %v443_v18  ;;  %v453_v20 = vpop.permute.xlu0 %452  ;;  %v465_v24 = vrot.slane %v462_v21, 4 }
 0x102   : > { %456 = vst.msk [vmem:[#allocation2 + $0x7c] sm:$0xf] %vm455_vm13, %v453_v20  ;;  %v837_v22 = vcombine.high %v415_v9, %v442_v19  ;;  %v836_v23 = vcombine.low %v415_v9, %v442_v19 }
 0x104   : > { %621 = vmatprep.subr.bf16.mxu0 %v837_v22  ;;  %v480_v27 = vpop.permute.xlu1 %479 }
 0x105   : > { %v464_v25 = vpop.permute.xlu0 %463  ;;  %622 = vmatpush1.bf16.msra.mxu0 %v836_v23 }
 0x106   : > { %v466_v26 = vrot.slane %v464_v25, 4 }
 0x108   : > { %v467_v28 = vsel %vm276_vm0, %v465_v24, %v466_v26  ;;  %v470_v29 = vsel %vm468_vm15, %v464_v25, %v466_v26  ;;  %v952_v32 = vld [vmem:[#allocation2 + $0x68] ss:$16 sps:$4 sm:$0xff]  }
 0x109   : > { %v469_v30 = vsel %vm468_vm15, %v462_v21, %v467_v28  ;;  %476 = vst.msk [vmem:[#allocation2 + $0x88] sm:$0xff] %vm475_vm1, %v470_v29  ;;  %v950_v31 = vld [vmem:[#allocation2 + $0x6c] ss:$16 sps:$4 sm:$0xff]  }
 0x10a   : > { %483 = vst.msk [vmem:[#allocation2 + $0x8c] sm:$0xf] %vm482_vm2, %v480_v27  ;;  %v841_v33 = vcombine.high %v469_v30, %v469_v30  ;;  %v840_v34 = vcombine.low %v469_v30, %v469_v30  ;;  %662 = vmatprep.subr.bf16.mxu1 %v950_v31 }
 0x10b   : > { %663 = vmatpush1.bf16.msra.mxu1 %v952_v32 }
 0x10c   : > { %844 = vmatprep.subr.msk.bf16.mxu0 %vm276_vm0, %v841_v33  ;;  %v604_v35 = vsel %vm276_vm0, %v840_v34, 0 }
 0x10d   : > { %624 = vmatpush1.bf16.msra.mxu0 %v604_v35 }
 0x110   : > { %845 = vmatmul.mubr.msk.bf16.vlgmr.msra.gmra.mrb[0].mxu0 %vm599_vm3, %v484_v36 }
 0x111   : > { %v502_v37 = vld [vmem:[#allocation2 + $0x88] sm:$0xff] }
 0x112   : > { %v843_v38 = vcombine.high %v502_v37, %v502_v37  ;;  %v842_v39 = vcombine.low %v502_v37, %v502_v37 }
 0x114   : > { %846 = vmatprep.subr.msk.bf16.mxu1 %vm276_vm0, %v843_v38  ;;  %v610_v40 = vsel %vm276_vm0, %v842_v39, 0 }
 0x115   : > { %665 = vmatpush1.bf16.msra.mxu1 %v610_v40 }
 0x116   : > { %v507_v41 = vpop.permute.xlu0 %506 }
 0x118   : > { %847 = vmatmul.mubr.msk.bf16.vlgmr.msra.gmra.mrb[0].mxu1 %vm599_vm3, %v484_v36 }
 0x1e3   : > { %v649_v42 = vpop.f32.mrb[0].mxu0 }
 0x1e4   : > { %v650_v43 = vadd.f32 %v649_v42, %v507_v41  ;;  %v651_v44 = vpop.f32.mrb[1].mxu0 }
 0x1e5   : > { %v652_v45 = vadd.f32 %v651_v44, %v507_v41  ;;  %v653_v46 = vpop.f32.mrb[2].mxu0 }
 0x1e6   : > { %697 = vst [vmem:[%s256_s10] sm:$0xff] %v650_v43  ;;  %v654_v47 = vpop.f32.mrb[3].mxu0 }
 0x1e7   : > { %698 = vst [vmem:[%s256_s10 + $0x8] sm:$0xff] %v652_v45 }
 0x1eb   : > { %v690_v48 = vpop.f32.mrb[0].mxu1 }
 0x1ec   : > { %v691_v49 = vadd.f32 %v690_v48, %v507_v41  ;;  %v692_v50 = vpop.f32.mrb[1].mxu1 }
 0x1ed   : > { %v693_v51 = vadd.f32 %v692_v50, %v507_v41  ;;  %v694_v52 = vpop.f32.mrb[2].mxu1 }
 0x1ee   : > { %699 = vst [vmem:[%s256_s10 + $0x10] sm:$0xff] %v691_v49  ;;  %v695_v53 = vpop.f32.mrb[3].mxu1 }
 0x1ef   : > { %700 = vst [vmem:[%s256_s10 + $0x18] sm:$0xff] %v693_v51 }
 0x1f0   : > { %1029 = shalt.err (!%p1026_p2)
}
 0x1f1   : > { %s1030_s6 = scalar_lea.hbm %s1418_s25, 512  ;;  %s1034_s8 = scalar_lea.hbm %s1475_s4, 1024 }
 0x1f2   : > { %p1031_p9 = scmp.ne.s32.totalorder %s1418_s25, %s1030_s6  ;;  %p1035_p7 = scmp.lt.u32.totalorder %s1418_s25, %s1475_s4 }
 0x1f3   : > { %p1036_p6 = scmp.lt.u32.totalorder %s1034_s8, %s1030_s6  ;;  %p1038_p10 = scmp.lt.u32.totalorder %s1030_s6, %s1418_s25 }
 0x1f4   : > { %p1032_p0 = pnand %p1031_p9, %p1499_p5 }
 0x1f5   : > { %p1037_p11 = por %p1036_p6, %p1035_p7 }
 0x1f6   : > { %p1033_p1 = pneg %p1032_p0 }
 0x1f7   : > { %p1039_p4 = por %p1038_p10, %p1037_p11 }
 0x1f9   : > { %p1040_p12 = pnand %p1039_p4, %p1033_p1 }
 0x1fb   : > { %1043 = shalt.err (!%p1040_p12)
}
 0x1fc   : > { %865 = dma.vmem_to_hbm [thread:$0]  (%p1499_p5), %s1420_s9, 512, %s1418_s25, %s702_s22  }
 0x1fd PF: > { %s728_s29 = sand.u32 1, %s1098_s18   ;;  %p1500_p3 = scmp.ne.s32.totalorder %s1486_s5, 0 }
 0x1fe   : > { %p1501_p8 = scmp.ge.s32.totalorder %s1110_s21, 2  ;;  %s729_s11 = scalar_lea.sflag [#allocation5], %s728_s29 }
 0x200   : > { %p875_p13 = pnand %p1501_p8, %p1500_p3 }
 0x202   : > { %1081 = dma.done.wait (!%p875_p13), %s729_s11, 512  }
 0x203   : > { %1083 = vsyncadd (!%p875_p13), %s729_s11, 4294966784  ;;  %p20_p5 = scmp.ge.s32.totalorder %s1189_s24, 4   ;;  %s1502_s15 = smov %s1090_s16 }
 0x204   : > { %s1503_s16 = smov %s1094_s17  ;;  %s1504_s17 = smov %s1296_s23 }
 0x205   : > { %s1505_s18 = smov %s1102_s19  ;;  %s1506_s19 = smov %s1106_s20 }
 0x206   : > { %s1507_s20 = smov %s1201_s27  ;;  %s1508_s21 = smov %s1189_s24 }
 0x207   :  { %22 = sbr.rel (!%p20_p5) target bundleno = 11 (0xb), region = 94 }
 0x20e   :  { %734 = vsyncpa [#allocation4], 1 }
 0x20f   :  { %736 = vsyncpa [#allocation4 + $0x1], 1 }
 0x210   :  { %737 = vsyncpa [#allocation7], 1 }
 0x211   :  { %739 = vsyncpa [#allocation7 + $0x1], 1 }
 0x212   :  { %740 = vsyncpa [#allocation5], 1 }
 0x213   :  { %742 = vsyncpa [#allocation5 + $0x1], 1 }

</bundles_post_ra>
